<compile_context>
chip_gen: v7x
topology: tpu7x:2x2x1
jax: 0.10.0
libtpu: 0.0.40
codegen_flags: <defaults>
</compile_context>

<pallas_src>
import functools

import jax
import jax.numpy as jnp
from jax.experimental import pallas as pl
from jax.experimental.pallas import tpu as pltpu


# ---------------------------------------------------------------------------
# Model hyperparameters (small, consistent with the PyTorch module signature)
# ---------------------------------------------------------------------------
INPUT_DIM = 16
LATENT_DIM = 8
HIDDEN_DIM = 32
NUM_LAYERS = 3
BATCH = 2

LANE = 128  # TPU lane width; all in-kernel activations are padded to this.


def _round_up(n, m):
    return ((n + m - 1) // m) * m


# ---------------------------------------------------------------------------
# PyTorch-style parameter init (unpacked, for the pure-JAX reference)
# ---------------------------------------------------------------------------
def _init_linear(key, fan_in, fan_out):
    """W with shape (fan_in, fan_out) (pre-transposed for x @ W), b (1, fan_out)."""
    kw, kb = jax.random.split(key)
    bound = 1.0 / jnp.sqrt(float(fan_in))
    w = jax.random.uniform(kw, (fan_in, fan_out), jnp.float32, -bound, bound)
    b = jax.random.uniform(kb, (1, fan_out), jnp.float32, -bound, bound)
    return w, b


def init_tbvae_params(key, input_dim, latent_dim, hidden_dim, num_layers):
    """Flat list [W, b, ...] in order: encoder layers, mu, logvar, decoder layers, output."""
    params = []
    keys = iter(jax.random.split(key, 2 * num_layers + 3))

    dims_in = [input_dim] + [hidden_dim] * (num_layers - 1)
    for d_in in dims_in:
        params.extend(_init_linear(next(keys), d_in, hidden_dim))

    params.extend(_init_linear(next(keys), hidden_dim, latent_dim))   # mu
    params.extend(_init_linear(next(keys), hidden_dim, latent_dim))   # logvar

    dims_in = [latent_dim] + [hidden_dim] * (num_layers - 1)
    for d_in in dims_in:
        params.extend(_init_linear(next(keys), d_in, hidden_dim))

    params.extend(_init_linear(next(keys), hidden_dim, input_dim))    # output
    return params


# ---------------------------------------------------------------------------
# Pack the unpacked params into two padded slabs consumed by the kernel
# ---------------------------------------------------------------------------
def pack_params(params, *, input_dim, latent_dim, hidden_dim, num_layers):
    """Returns (W_stack (n_lin,128,128) f32, b_stack (n_lin,1,128) f32).

    Slab order: encoder layers [num_layers], fused mu|logvar head [1],
                decoder layers [num_layers], output [1].
    The fused head writes mu to lanes [input_dim, input_dim+latent) and logvar to
    [input_dim+latent, input_dim+2*latent); decoder layer 0 expects z at the mu lanes.
    """
    assert hidden_dim <= LANE and input_dim + 2 * latent_dim <= LANE
    n_lin = 2 * num_layers + 2
    w_stack = jnp.zeros((n_lin, LANE, LANE), jnp.float32)
    b_stack = jnp.zeros((n_lin, 1, LANE), jnp.float32)

    mu_off = input_dim
    lv_off = input_dim + latent_dim

    pi = 0
    slab = 0

    # encoder layers
    for _ in range(num_layers):
        w, b = params[pi], params[pi + 1]; pi += 2
        fi, fo = w.shape
        w_stack = w_stack.at[slab, :fi, :fo].set(w)
        b_stack = b_stack.at[slab, 0, :fo].set(b[0])
        slab += 1

    # fused mu | logvar head (one matmul)
    w_mu, b_mu = params[pi], params[pi + 1]; pi += 2
    w_lv, b_lv = params[pi], params[pi + 1]; pi += 2
    w_stack = w_stack.at[slab, :hidden_dim, mu_off:mu_off + latent_dim].set(w_mu)
    w_stack = w_stack.at[slab, :hidden_dim, lv_off:lv_off + latent_dim].set(w_lv)
    b_stack = b_stack.at[slab, 0, mu_off:mu_off + latent_dim].set(b_mu[0])
    b_stack = b_stack.at[slab, 0, lv_off:lv_off + latent_dim].set(b_lv[0])
    slab += 1

    # decoder layer 0: (latent -> hidden), rows aligned with the mu lanes of z
    w, b = params[pi], params[pi + 1]; pi += 2
    w_stack = w_stack.at[slab, mu_off:mu_off + latent_dim, :hidden_dim].set(w)
    b_stack = b_stack.at[slab, 0, :hidden_dim].set(b[0])
    slab += 1

    # decoder layers 1..num_layers-1
    for _ in range(1, num_layers):
        w, b = params[pi], params[pi + 1]; pi += 2
        w_stack = w_stack.at[slab, :hidden_dim, :hidden_dim].set(w)
        b_stack = b_stack.at[slab, 0, :hidden_dim].set(b[0])
        slab += 1

    # output layer: (hidden -> input_dim)
    w, b = params[pi], params[pi + 1]; pi += 2
    w_stack = w_stack.at[slab, :hidden_dim, :input_dim].set(w)
    b_stack = b_stack.at[slab, 0, :input_dim].set(b[0])
    slab += 1

    assert slab == n_lin and pi == len(params)
    _check_pack_invariants(w_stack, b_stack, input_dim=input_dim,
                           latent_dim=latent_dim, num_layers=num_layers)
    return w_stack, b_stack


def _check_pack_invariants(w_stack, b_stack, *, input_dim, latent_dim, num_layers):
    """Exact-zero lane bands the kernel's lane-fusion tricks rely on."""
    head = num_layers
    dec0 = num_layers + 1
    outl = 2 * num_layers + 1
    mu_off = input_dim
    lv_end = input_dim + 2 * latent_dim

    # head slab: columns below input_dim and above input_dim+2*latent are zero
    assert not bool(jnp.any(w_stack[head, :, :mu_off] != 0))
    assert not bool(jnp.any(w_stack[head, :, lv_end:] != 0))
    assert not bool(jnp.any(b_stack[head, :, :mu_off] != 0))
    assert not bool(jnp.any(b_stack[head, :, lv_end:] != 0))
    # output slab: columns >= input_dim are zero (so out = ml + recon is exact)
    assert not bool(jnp.any(w_stack[outl, :, input_dim:] != 0))
    assert not bool(jnp.any(b_stack[outl, :, input_dim:] != 0))
    # decoder-0 slab: rows outside the mu lanes are zero (masks x/eps garbage in z)
    assert not bool(jnp.any(w_stack[dec0, :mu_off, :] != 0))
    assert not bool(jnp.any(w_stack[dec0, mu_off + latent_dim:, :] != 0))


# ---------------------------------------------------------------------------
# Pallas kernel: full VAE forward (encode -> reparameterize -> decode)
# ---------------------------------------------------------------------------
def _tbvae_kernel(num_layers, latent_dim, xe_w,
                  xe_ref, w_ref, b_ref, out_ref, xpad_ref):
    """Activations are (TB, 128) f32; every matmul is (TB,128) @ (128,128) on the MXU.

    xe_ref : (TB, xe_w)      natural-width fused input: x | eps
    w_ref  : (n_lin,128,128) packed weight slabs (resident, constant index_map)
    b_ref  : (n_lin,1,128)   packed bias slabs
    out_ref: (TB, 128)       lane-dense output: recon | mu | logvar | zeros
    xpad_ref: (TB, 128)      VMEM scratch holding the 128-lane padded input
    """

    def linear(h, li):
        return (
            jnp.dot(h, w_ref[li], preferred_element_type=jnp.float32)
            + b_ref[li]              # (1, 128) broadcast over batch rows
        )

    # Embed the natural-width (x | eps) tile into 128-lane space inside VMEM.
    # Lanes: [0,input_dim)=x, [input_dim,input_dim+latent)=eps, rest exactly 0.
    xpad_ref[...] = jnp.zeros_like(xpad_ref)
    xpad_ref[:, :xe_w] = xe_ref[...]

    li = 0

    # ----- encoder: (Linear -> ReLU -> Dropout[identity]) x num_layers -----
    h = xpad_ref[...]
    for _ in range(num_layers):
        h = jnp.maximum(linear(h, li), 0.0)
        li += 1

    # ----- fused mu/logvar head: one matmul -----
    # ml lanes: [0,in)=0, [in,in+lat)=mu, [in+lat,in+2lat)=logvar, rest 0.
    # Store it to the output block immediately so it isn't kept live (spilled)
    # across the decoder matmuls; recon is accumulated into out_ref at the end.
    ml = linear(h, li); li += 1
    out_ref[...] = ml

    # ----- reparameterize: z = mu + eps * exp(0.5 * logvar) -----
    # pltpu.roll by (LANE - latent) aligns the logvar lanes onto the mu lanes
    # (single XLU vrot). Lanes outside the mu band get x * exp(.)-style garbage,
    # but decoder-0 weight rows are zero there, so it never propagates.
    std_aligned = jnp.exp(0.5 * pltpu.roll(ml, LANE - latent_dim, 1))
    z = ml + xpad_ref[...] * std_aligned

    # ----- decoder: (Linear -> ReLU -> Dropout[identity]) x num_layers -----
    h = z
    for _ in range(num_layers):
        h = jnp.maximum(linear(h, li), 0.0)
        li += 1

    # ----- decoder output Linear(hidden, input_dim): lanes [0, input_dim) -----
    recon = linear(h, li); li += 1

    # recon occupies lanes [0,in) (ml is zero there); ml holds mu/logvar at the
    # next 2*latent lanes (recon is zero there); remaining lanes stay exact zeros.
    out_ref[...] = out_ref[...] + recon


def tbvae_forward(x, eps, w_stack, b_stack, *, input_dim, latent_dim, num_layers,
                  block_b=2048):
    """Runs the whole VAE forward in one pallas_call with a batch grid."""
    B = x.shape[0]
    n_lin = w_stack.shape[0]
    xe_w = input_dim + latent_dim

    # Fused natural-width input: x at lanes [0,input_dim), eps at the mu lanes.
    # (No padded 128-lane slab is ever materialized in HBM.)
    xe = jnp.concatenate([x.astype(jnp.float32), eps.astype(jnp.float32)], axis=-1)

    # Batch tile: multiple of 8 sublanes; capped so the grid has >= 2 steps whenever
    # possible (lets the "parallel" axis shard across v7x's two TensorCores).
    b8 = _round_up(max(B, 1), 8)
    tb = min(block_b, b8)
    if b8 >= 16:
        tb = min(tb, _round_up(-(-b8 // 2), 8))
    tb = max(8, (tb // 8) * 8)
    grid_b = -(-b8 // tb)
    b_pad = grid_b * tb

    if b_pad != B:
        xe = jnp.pad(xe, ((0, b_pad - B), (0, 0)))

    kernel = functools.partial(_tbvae_kernel, num_layers, latent_dim, xe_w)

    out = pl.pallas_call(
        kernel,
        out_shape=jax.ShapeDtypeStruct((b_pad, LANE), jnp.float32),
        grid_spec=pltpu.PrefetchScalarGridSpec(
            num_scalar_prefetch=0,
            grid=(grid_b,),
            in_specs=[
                pl.BlockSpec((tb, xe_w), lambda i: (i, 0)),              # fused x|eps tile
                pl.BlockSpec((n_lin, LANE, LANE), lambda i: (0, 0, 0)),  # weights (resident)
                pl.BlockSpec((n_lin, 1, LANE), lambda i: (0, 0, 0)),     # biases (resident)
            ],
            out_specs=pl.BlockSpec((tb, LANE), lambda i: (i, 0)),
            scratch_shapes=[pltpu.VMEM((tb, LANE), jnp.float32)],        # padded input
        ),
        compiler_params=pltpu.CompilerParams(
            dimension_semantics=("parallel",)),
    )(xe, w_stack, b_stack)

    recon = out[:B, :input_dim]
    mu = out[:B, input_dim:input_dim + latent_dim]
    logvar = out[:B, input_dim + latent_dim:input_dim + 2 * latent_dim]
    return recon, mu, logvar


# ---------------------------------------------------------------------------
# Pure-JAX reference (uses the unpacked params)
# ---------------------------------------------------------------------------
def tbvae_reference(x, eps, params, *, num_layers):
    idx = 0

    def lin(h, i):
        return h @ params[2 * i] + params[2 * i + 1]

    h = x
    for _ in range(num_layers):
        h = jnp.maximum(lin(h, idx), 0.0); idx += 1
    mu = lin(h, idx); idx += 1
    logvar = lin(h, idx); idx += 1
    z = mu + eps * jnp.exp(0.5 * logvar)
    h = z
    for _ in range(num_layers):
        h = jnp.maximum(lin(h, idx), 0.0); idx += 1
    recon = lin(h, idx); idx += 1
    return recon, mu, logvar


if __name__ == "__main__":
    key = jax.random.PRNGKey(0)
    k_params, k_x, k_eps = jax.random.split(key, 3)

    params = init_tbvae_params(
        k_params, INPUT_DIM, LATENT_DIM, HIDDEN_DIM, NUM_LAYERS)
    w_stack, b_stack = pack_params(
        params, input_dim=INPUT_DIM, latent_dim=LATENT_DIM,
        hidden_dim=HIDDEN_DIM, num_layers=NUM_LAYERS)

    x = jax.random.normal(k_x, (BATCH, INPUT_DIM), jnp.float32)
    eps = jax.random.normal(k_eps, (BATCH, LATENT_DIM), jnp.float32)

    recon, mu, logvar = tbvae_forward(
        x, eps, w_stack, b_stack,
        input_dim=INPUT_DIM, latent_dim=LATENT_DIM, num_layers=NUM_LAYERS)
    jax.block_until_ready((recon, mu, logvar))

    # sanity check against pure-JAX reference
    r_ref, mu_ref, lv_ref = tbvae_reference(x, eps, params, num_layers=NUM_LAYERS)
    assert recon.shape == (BATCH, INPUT_DIM)
    assert mu.shape == (BATCH, LATENT_DIM)
    assert logvar.shape == (BATCH, LATENT_DIM)
    assert jnp.allclose(recon, r_ref, atol=1e-3, rtol=1e-3), \
        float(jnp.max(jnp.abs(recon - r_ref)))
    assert jnp.allclose(mu, mu_ref, atol=1e-3, rtol=1e-3), \
        float(jnp.max(jnp.abs(mu - mu_ref)))
    assert jnp.allclose(logvar, lv_ref, atol=1e-3, rtol=1e-3), \
        float(jnp.max(jnp.abs(logvar - lv_ref)))

    print("KERNEL_OK")
</pallas_src>

<mosaic_0001>
module attributes {stable_mosaic.version = 11 : i64} {
  func.func @_tbvae_kernel(%arg0: i32, %arg1: memref<8x24xf32, #tpu.memory_space<vmem>>, %arg2: memref<8x128x128xf32, #tpu.memory_space<vmem>>, %arg3: memref<8x1x128xf32, #tpu.memory_space<vmem>>, %arg4: memref<8x128xf32, #tpu.memory_space<vmem>>, %arg5: memref<8x128xf32, #tpu.memory_space<vmem>>) attributes {dimension_semantics = [#tpu.dimension_semantics<parallel>], iteration_bounds = array<i64: 1>, scalar_prefetch = 0 : i64, scratch_operands = 1 : i64, tpu.core_type = #tpu.core_type<tc>, window_params = [{transform_indices = @transform_0, window_bounds = array<i64: 8, 24>}, {pipeline_mode = #tpu.pipeline_mode<synchronous>, transform_indices = @transform_1, window_bounds = array<i64: 8, 128, 128>}, {pipeline_mode = #tpu.pipeline_mode<synchronous>, transform_indices = @transform_2, window_bounds = array<i64: 8, 1, 128>}, {transform_indices = @transform_3, window_bounds = array<i64: 8, 128>}]} {
    %cst = arith.constant 0.000000e+00 : f32
    %0 = vector.broadcast %cst : f32 to vector<8x128xf32>
    %c0 = arith.constant 0 : index
    %c0_0 = arith.constant 0 : index
    %1 = vector.load %arg5[%c0, %c0_0] : memref<8x128xf32, #tpu.memory_space<vmem>>, vector<8x128xf32>
    tpu.vector_store %arg5[%c0, %c0_0], %0 {strides = array<i32>} : memref<8x128xf32, #tpu.memory_space<vmem>>, vector<8x128xf32>,
    %c0_1 = arith.constant 0 : index
    %c0_2 = arith.constant 0 : index
    %2 = vector.load %arg1[%c0_1, %c0_2] : memref<8x24xf32, #tpu.memory_space<vmem>>, vector<8x24xf32>
    %c0_3 = arith.constant 0 : index
    %c0_4 = arith.constant 0 : index
    %3 = vector.load %arg5[%c0_3, %c0_4] : memref<8x128xf32, #tpu.memory_space<vmem>>, vector<8x24xf32>
    tpu.vector_store %arg5[%c0_3, %c0_4], %2 {strides = array<i32>} : memref<8x128xf32, #tpu.memory_space<vmem>>, vector<8x24xf32>,
    %c0_5 = arith.constant 0 : index
    %c0_6 = arith.constant 0 : index
    %4 = vector.load %arg5[%c0_5, %c0_6] : memref<8x128xf32, #tpu.memory_space<vmem>>, vector<8x128xf32>
    %c0_7 = arith.constant 0 : index
    %c0_8 = arith.constant 0 : index
    %c0_9 = arith.constant 0 : index
    %5 = vector.load %arg2[%c0_7, %c0_8, %c0_9] : memref<8x128x128xf32, #tpu.memory_space<vmem>>, vector<1x128x128xf32>
    %6 = vector.shape_cast %5 : vector<1x128x128xf32> to vector<128x128xf32>
    %cst_10 = arith.constant dense<0.000000e+00> : vector<8x128xf32>
    %7 = tpu.matmul %4, %6, %cst_10 {dimension_numbers = #tpu.dot_dimension_numbers<[1], [0], [0], [1], [0, 0, 1, 1], [], []>} : vector<8x128xf32>, vector<128x128xf32>, vector<8x128xf32> -> vector<8x128xf32>
    %c0_11 = arith.constant 0 : index
    %c0_12 = arith.constant 0 : index
    %c0_13 = arith.constant 0 : index
    %8 = vector.load %arg3[%c0_11, %c0_12, %c0_13] : memref<8x1x128xf32, #tpu.memory_space<vmem>>, vector<1x1x128xf32>
    %9 = vector.shape_cast %8 : vector<1x1x128xf32> to vector<1x128xf32>
    %10 = vector.broadcast %9 : vector<1x128xf32> to vector<8x128xf32>
    %11 = arith.addf %7, %10 : vector<8x128xf32>
    %cst_14 = arith.constant 0.000000e+00 : f32
    %12 = vector.broadcast %cst_14 : f32 to vector<8x128xf32>
    %13 = arith.maximumf %11, %12 : vector<8x128xf32>
    %c1 = arith.constant 1 : index
    %c0_15 = arith.constant 0 : index
    %c0_16 = arith.constant 0 : index
    %14 = vector.load %arg2[%c1, %c0_15, %c0_16] : memref<8x128x128xf32, #tpu.memory_space<vmem>>, vector<1x128x128xf32>
    %15 = vector.shape_cast %14 : vector<1x128x128xf32> to vector<128x128xf32>
    %cst_17 = arith.constant dense<0.000000e+00> : vector<8x128xf32>
    %16 = tpu.matmul %13, %15, %cst_17 {dimension_numbers = #tpu.dot_dimension_numbers<[1], [0], [0], [1], [0, 0, 1, 1], [], []>} : vector<8x128xf32>, vector<128x128xf32>, vector<8x128xf32> -> vector<8x128xf32>
    %c1_18 = arith.constant 1 : index
    %c0_19 = arith.constant 0 : index
    %c0_20 = arith.constant 0 : index
    %17 = vector.load %arg3[%c1_18, %c0_19, %c0_20] : memref<8x1x128xf32, #tpu.memory_space<vmem>>, vector<1x1x128xf32>
    %18 = vector.shape_cast %17 : vector<1x1x128xf32> to vector<1x128xf32>
    %19 = vector.broadcast %18 : vector<1x128xf32> to vector<8x128xf32>
    %20 = arith.addf %16, %19 : vector<8x128xf32>
    %cst_21 = arith.constant 0.000000e+00 : f32
    %21 = vector.broadcast %cst_21 : f32 to vector<8x128xf32>
    %22 = arith.maximumf %20, %21 : vector<8x128xf32>
    %c2 = arith.constant 2 : index
    %c0_22 = arith.constant 0 : index
    %c0_23 = arith.constant 0 : index
    %23 = vector.load %arg2[%c2, %c0_22, %c0_23] : memref<8x128x128xf32, #tpu.memory_space<vmem>>, vector<1x128x128xf32>
    %24 = vector.shape_cast %23 : vector<1x128x128xf32> to vector<128x128xf32>
    %cst_24 = arith.constant dense<0.000000e+00> : vector<8x128xf32>
    %25 = tpu.matmul %22, %24, %cst_24 {dimension_numbers = #tpu.dot_dimension_numbers<[1], [0], [0], [1], [0, 0, 1, 1], [], []>} : vector<8x128xf32>, vector<128x128xf32>, vector<8x128xf32> -> vector<8x128xf32>
    %c2_25 = arith.constant 2 : index
    %c0_26 = arith.constant 0 : index
    %c0_27 = arith.constant 0 : index
    %26 = vector.load %arg3[%c2_25, %c0_26, %c0_27] : memref<8x1x128xf32, #tpu.memory_space<vmem>>, vector<1x1x128xf32>
    %27 = vector.shape_cast %26 : vector<1x1x128xf32> to vector<1x128xf32>
    %28 = vector.broadcast %27 : vector<1x128xf32> to vector<8x128xf32>
    %29 = arith.addf %25, %28 : vector<8x128xf32>
    %cst_28 = arith.constant 0.000000e+00 : f32
    %30 = vector.broadcast %cst_28 : f32 to vector<8x128xf32>
    %31 = arith.maximumf %29, %30 : vector<8x128xf32>
    %c3 = arith.constant 3 : index
    %c0_29 = arith.constant 0 : index
    %c0_30 = arith.constant 0 : index
    %32 = vector.load %arg2[%c3, %c0_29, %c0_30] : memref<8x128x128xf32, #tpu.memory_space<vmem>>, vector<1x128x128xf32>
    %33 = vector.shape_cast %32 : vector<1x128x128xf32> to vector<128x128xf32>
    %cst_31 = arith.constant dense<0.000000e+00> : vector<8x128xf32>
    %34 = tpu.matmul %31, %33, %cst_31 {dimension_numbers = #tpu.dot_dimension_numbers<[1], [0], [0], [1], [0, 0, 1, 1], [], []>} : vector<8x128xf32>, vector<128x128xf32>, vector<8x128xf32> -> vector<8x128xf32>
    %c3_32 = arith.constant 3 : index
    %c0_33 = arith.constant 0 : index
    %c0_34 = arith.constant 0 : index
    %35 = vector.load %arg3[%c3_32, %c0_33, %c0_34] : memref<8x1x128xf32, #tpu.memory_space<vmem>>, vector<1x1x128xf32>
    %36 = vector.shape_cast %35 : vector<1x1x128xf32> to vector<1x128xf32>
    %37 = vector.broadcast %36 : vector<1x128xf32> to vector<8x128xf32>
    %38 = arith.addf %34, %37 : vector<8x128xf32>
    %c0_35 = arith.constant 0 : index
    %c0_36 = arith.constant 0 : index
    %39 = vector.load %arg4[%c0_35, %c0_36] : memref<8x128xf32, #tpu.memory_space<vmem>>, vector<8x128xf32>
    tpu.vector_store %arg4[%c0_35, %c0_36], %38 {strides = array<i32>} : memref<8x128xf32, #tpu.memory_space<vmem>>, vector<8x128xf32>,
    %c120_i32 = arith.constant 120 : i32
    %40 = tpu.dynamic_rotate %38 by %c120_i32 dim 1 : vector<8x128xf32>, i32 -> vector<8x128xf32>
    %cst_37 = arith.constant 5.000000e-01 : f32
    %41 = vector.broadcast %cst_37 : f32 to vector<8x128xf32>
    %42 = arith.mulf %41, %40 : vector<8x128xf32>
    %43 = math.exp %42 : vector<8x128xf32>
    %c0_38 = arith.constant 0 : index
    %c0_39 = arith.constant 0 : index
    %44 = vector.load %arg5[%c0_38, %c0_39] : memref<8x128xf32, #tpu.memory_space<vmem>>, vector<8x128xf32>
    %45 = arith.mulf %44, %43 : vector<8x128xf32>
    %46 = arith.addf %38, %45 : vector<8x128xf32>
    %c4 = arith.constant 4 : index
    %c0_40 = arith.constant 0 : index
    %c0_41 = arith.constant 0 : index
    %47 = vector.load %arg2[%c4, %c0_40, %c0_41] : memref<8x128x128xf32, #tpu.memory_space<vmem>>, vector<1x128x128xf32>
    %48 = vector.shape_cast %47 : vector<1x128x128xf32> to vector<128x128xf32>
    %cst_42 = arith.constant dense<0.000000e+00> : vector<8x128xf32>
    %49 = tpu.matmul %46, %48, %cst_42 {dimension_numbers = #tpu.dot_dimension_numbers<[1], [0], [0], [1], [0, 0, 1, 1], [], []>} : vector<8x128xf32>, vector<128x128xf32>, vector<8x128xf32> -> vector<8x128xf32>
    %c4_43 = arith.constant 4 : index
    %c0_44 = arith.constant 0 : index
    %c0_45 = arith.constant 0 : index
    %50 = vector.load %arg3[%c4_43, %c0_44, %c0_45] : memref<8x1x128xf32, #tpu.memory_space<vmem>>, vector<1x1x128xf32>
    %51 = vector.shape_cast %50 : vector<1x1x128xf32> to vector<1x128xf32>
    %52 = vector.broadcast %51 : vector<1x128xf32> to vector<8x128xf32>
    %53 = arith.addf %49, %52 : vector<8x128xf32>
    %cst_46 = arith.constant 0.000000e+00 : f32
    %54 = vector.broadcast %cst_46 : f32 to vector<8x128xf32>
    %55 = arith.maximumf %53, %54 : vector<8x128xf32>
    %c5 = arith.constant 5 : index
    %c0_47 = arith.constant 0 : index
    %c0_48 = arith.constant 0 : index
    %56 = vector.load %arg2[%c5, %c0_47, %c0_48] : memref<8x128x128xf32, #tpu.memory_space<vmem>>, vector<1x128x128xf32>
    %57 = vector.shape_cast %56 : vector<1x128x128xf32> to vector<128x128xf32>
    %cst_49 = arith.constant dense<0.000000e+00> : vector<8x128xf32>
    %58 = tpu.matmul %55, %57, %cst_49 {dimension_numbers = #tpu.dot_dimension_numbers<[1], [0], [0], [1], [0, 0, 1, 1], [], []>} : vector<8x128xf32>, vector<128x128xf32>, vector<8x128xf32> -> vector<8x128xf32>
    %c5_50 = arith.constant 5 : index
    %c0_51 = arith.constant 0 : index
    %c0_52 = arith.constant 0 : index
    %59 = vector.load %arg3[%c5_50, %c0_51, %c0_52] : memref<8x1x128xf32, #tpu.memory_space<vmem>>, vector<1x1x128xf32>
    %60 = vector.shape_cast %59 : vector<1x1x128xf32> to vector<1x128xf32>
    %61 = vector.broadcast %60 : vector<1x128xf32> to vector<8x128xf32>
    %62 = arith.addf %58, %61 : vector<8x128xf32>
    %cst_53 = arith.constant 0.000000e+00 : f32
    %63 = vector.broadcast %cst_53 : f32 to vector<8x128xf32>
    %64 = arith.maximumf %62, %63 : vector<8x128xf32>
    %c6 = arith.constant 6 : index
    %c0_54 = arith.constant 0 : index
    %c0_55 = arith.constant 0 : index
    %65 = vector.load %arg2[%c6, %c0_54, %c0_55] : memref<8x128x128xf32, #tpu.memory_space<vmem>>, vector<1x128x128xf32>
    %66 = vector.shape_cast %65 : vector<1x128x128xf32> to vector<128x128xf32>
    %cst_56 = arith.constant dense<0.000000e+00> : vector<8x128xf32>
    %67 = tpu.matmul %64, %66, %cst_56 {dimension_numbers = #tpu.dot_dimension_numbers<[1], [0], [0], [1], [0, 0, 1, 1], [], []>} : vector<8x128xf32>, vector<128x128xf32>, vector<8x128xf32> -> vector<8x128xf32>
    %c6_57 = arith.constant 6 : index
    %c0_58 = arith.constant 0 : index
    %c0_59 = arith.constant 0 : index
    %68 = vector.load %arg3[%c6_57, %c0_58, %c0_59] : memref<8x1x128xf32, #tpu.memory_space<vmem>>, vector<1x1x128xf32>
    %69 = vector.shape_cast %68 : vector<1x1x128xf32> to vector<1x128xf32>
    %70 = vector.broadcast %69 : vector<1x128xf32> to vector<8x128xf32>
    %71 = arith.addf %67, %70 : vector<8x128xf32>
    %cst_60 = arith.constant 0.000000e+00 : f32
    %72 = vector.broadcast %cst_60 : f32 to vector<8x128xf32>
    %73 = arith.maximumf %71, %72 : vector<8x128xf32>
    %c7 = arith.constant 7 : index
    %c0_61 = arith.constant 0 : index
    %c0_62 = arith.constant 0 : index
    %74 = vector.load %arg2[%c7, %c0_61, %c0_62] : memref<8x128x128xf32, #tpu.memory_space<vmem>>, vector<1x128x128xf32>
    %75 = vector.shape_cast %74 : vector<1x128x128xf32> to vector<128x128xf32>
    %cst_63 = arith.constant dense<0.000000e+00> : vector<8x128xf32>
    %76 = tpu.matmul %73, %75, %cst_63 {dimension_numbers = #tpu.dot_dimension_numbers<[1], [0], [0], [1], [0, 0, 1, 1], [], []>} : vector<8x128xf32>, vector<128x128xf32>, vector<8x128xf32> -> vector<8x128xf32>
    %c7_64 = arith.constant 7 : index
    %c0_65 = arith.constant 0 : index
    %c0_66 = arith.constant 0 : index
    %77 = vector.load %arg3[%c7_64, %c0_65, %c0_66] : memref<8x1x128xf32, #tpu.memory_space<vmem>>, vector<1x1x128xf32>
    %78 = vector.shape_cast %77 : vector<1x1x128xf32> to vector<1x128xf32>
    %79 = vector.broadcast %78 : vector<1x128xf32> to vector<8x128xf32>
    %80 = arith.addf %76, %79 : vector<8x128xf32>
    %c0_67 = arith.constant 0 : index
    %c0_68 = arith.constant 0 : index
    %81 = vector.load %arg4[%c0_67, %c0_68] : memref<8x128xf32, #tpu.memory_space<vmem>>, vector<8x128xf32>
    %82 = arith.addf %81, %80 : vector<8x128xf32>
    %c0_69 = arith.constant 0 : index
    %c0_70 = arith.constant 0 : index
    %83 = vector.load %arg4[%c0_69, %c0_70] : memref<8x128xf32, #tpu.memory_space<vmem>>, vector<8x128xf32>
    tpu.vector_store %arg4[%c0_69, %c0_70], %82 {strides = array<i32>} : memref<8x128xf32, #tpu.memory_space<vmem>>, vector<8x128xf32>,
    return
  }
  func.func @transform_0(%arg0: i32) -> (i32, i32) {
    %c0_i32 = arith.constant 0 : i32
    %c0_i32_0 = arith.constant 0 : i32
    return %arg0, %c0_i32 : i32, i32
  }
  func.func @transform_1(%arg0: i32) -> (i32, i32, i32) {
    %c0_i32 = arith.constant 0 : i32
    %c0_i32_0 = arith.constant 0 : i32
    %c0_i32_1 = arith.constant 0 : i32
    %c0_i32_2 = arith.constant 0 : i32
    return %c0_i32, %c0_i32_0, %c0_i32_1 : i32, i32, i32
  }
  func.func @transform_2(%arg0: i32) -> (i32, i32, i32) {
    %c0_i32 = arith.constant 0 : i32
    %c0_i32_0 = arith.constant 0 : i32
    %c0_i32_1 = arith.constant 0 : i32
    %c0_i32_2 = arith.constant 0 : i32
    return %c0_i32, %c0_i32_0, %c0_i32_1 : i32, i32, i32
  }
  func.func @transform_3(%arg0: i32) -> (i32, i32) {
    %c0_i32 = arith.constant 0 : i32
    %c0_i32_0 = arith.constant 0 : i32
    return %arg0, %c0_i32 : i32, i32
  }
}

</mosaic_0001>

<bundles_post_ra>
// kernel: tpu_custom_call.1
= control target key start
LH: loop header
LB: loop body
LE: loop exit
PB: predicated region body
PF: predicated region fallthrough
CT: control target
= control target key end

     0   :  { %8 = vsyncpa [#allocation4], 0  ;;  %s1745_s0 = inlined_call_operand.hbm [shape: f32[8,24], index: 0, kind: input, shape index: {}]   ;;  %s1746_s1 = inlined_call_operand.hbm [shape: f32[8,128,128], index: 1, kind: input, shape index: {}]   ;;  %s1747_s2 = inlined_call_operand.hbm [shape: f32[8,1,128], index: 2, kind: input, shape index: {}]   ;;  %s1748_s3 = inlined_call_operand.hbm [shape: f32[8,128], index: 3, kind: output, shape index: {}]  }
   0x1   :  { %9 = vsyncpa [#allocation7], 0 }
   0x2   :  { %10 = vsyncpa [#allocation5], 0  ;;  %s1575_s12 = smov [#allocation6]   ;;  %s1481_s16 = scalar_lea.hbm %s1746_s1, 16384 }
   0x3   :  { %s26_s13 = sshll.u32 %s1575_s12, 4  ;;  %p1482_p0 = scmp.ne.s32.totalorder %s1746_s1, %s1481_s16  ;;  %s27_s13 = int_to_ptr.vmem [resolvable:$true] %s26_s13 }
   0x4   :  { %p1485_p1 = scmp.lt.u32.totalorder %s1481_s16, %s1746_s1 }
   0x6   :  { %p1487_p2 = pnand %p1485_p1, %p1482_p0 }
   0x8   :  { %1490 = shalt.err (!%p1487_p2)
}
   0x9   :  { %s1491_s21 = scalar_lea.vmem %s27_s13, 16384  ;;  %p1496_p4 = scmp.lt.s32.totalorder %s27_s13, %s27_s13 }
   0xa   :  { %p1492_p3 = scmp.ne.s32.totalorder %s27_s13, %s1491_s21  ;;  %p1497_p5 = scmp.lt.s32.totalorder %s1491_s21, %s1491_s21 }
   0xc   :  { %p1498_p6 = por %p1497_p5, %p1496_p4 }
   0xe   :  { %p1499_p7 = pnand %p1498_p6, %p1492_p3 }
  0x10   :  { %1502 = shalt.err (!%p1499_p7)
}
  0x11   :  { %s1576_s22 = smov 128   ;;  %s1577_s23 = smov 8  }
  0x12   :  { %32 = dma.hbm_to_vmem [thread:$0]  %s1746_s1, 16384, %s27_s13, [#allocation7], %s1576_s22, %s1576_s22, %s1577_s23  }
  0x13   :  { %s1578_s26 = smov [#allocation3]   ;;  %s1579_s28 = smov [#allocation8]  }
  0x14   :  { %s17_s27 = sshll.u32 %s1578_s26, 4  ;;  %s38_s29 = sshll.u32 %s1579_s28, 4  ;;  %s18_s27 = int_to_ptr.vmem [resolvable:$true] %s17_s27  ;;  %s39_s29 = int_to_ptr.vmem [resolvable:$true] %s38_s29 }
  0x15   :  { %s1503_s5 = scalar_lea.hbm %s1745_s0, 128 }
  0x16   :  { %p1504_p8 = scmp.ne.s32.totalorder %s1745_s0, %s1503_s5  ;;  %p1507_p9 = scmp.lt.u32.totalorder %s1503_s5, %s1745_s0 }
  0x18   :  { %p1509_p10 = pnand %p1507_p9, %p1504_p8 }
  0x1a   :  { %1512 = shalt.err (!%p1509_p10)
}
  0x1b   :  { %s1513_s1 = scalar_lea.vmem %s18_s27, 128  ;;  %p1518_p12 = scmp.lt.s32.totalorder %s18_s27, %s18_s27 }
  0x1c   :  { %p1514_p11 = scmp.ne.s32.totalorder %s18_s27, %s1513_s1  ;;  %p1519_p13 = scmp.lt.s32.totalorder %s1513_s1, %s1513_s1 }
  0x1e   :  { %p1520_p0 = por %p1519_p13, %p1518_p12 }
  0x20   :  { %p1521_p1 = pnand %p1520_p0, %p1514_p11 }
  0x22   :  { %1524 = shalt.err (!%p1521_p1)
}
  0x23   :  { %20 = dma.hbm_to_vmem [thread:$0]  %s1745_s0, 128, %s18_s27, [#allocation4]  }
  0x24   :  { %s1525_s14 = scalar_lea.hbm %s1747_s2, 128 }
  0x25   :  { %p1526_p2 = scmp.ne.s32.totalorder %s1747_s2, %s1525_s14  ;;  %p1529_p3 = scmp.lt.u32.totalorder %s1525_s14, %s1747_s2 }
  0x27   :  { %p1531_p4 = pnand %p1529_p3, %p1526_p2 }
  0x29   :  { %1534 = shalt.err (!%p1531_p4)
}
  0x2a   :  { %s1535_s19 = scalar_lea.vmem %s39_s29, 128  ;;  %p1540_p6 = scmp.lt.s32.totalorder %s39_s29, %s39_s29 }
  0x2b   :  { %p1536_p5 = scmp.ne.s32.totalorder %s39_s29, %s1535_s19  ;;  %p1541_p7 = scmp.lt.s32.totalorder %s1535_s19, %s1535_s19 }
  0x2d   :  { %p1542_p8 = por %p1541_p7, %p1540_p6 }
  0x2f   :  { %p1543_p9 = pnand %p1542_p8, %p1536_p5 }
  0x31   :  { %1546 = shalt.err (!%p1543_p9)
}
  0x32   :  { %s1580_s0 = smov 16   ;;  %s1581_s20 = smov 1  }
  0x33   :  { %44 = dma.hbm_to_vmem [thread:$0]  %s1747_s2, 128, %s39_s29, [#allocation7], %s1580_s0, %s1580_s0, %s1581_s20  }
  0x34   :  { %1569 = dma.done.wait [#allocation4], 128  }
  0x35   :  { %1570 = vsyncadd [#allocation4], 4294967168 }
  0x36   :  { %1571 = dma.done.wait [#allocation7], 16512  }
  0x37   :  { %1572 = vsyncadd [#allocation7], 4294950784  ;;  %v1582_v0 = vmov 0.0|0.0   ;;  %vm1583_vm0 = vmmov 0   ;;  %v1584_v1 = vmov 0.0   ;;  %v59_v2 = vld [vmem:[#allocation6] sm:$0xff] }
  0x38   :  { %1275 = vmatprep.subr.bf16.mxu0 %v1582_v0  ;;  %1027 = vmatprep.mubr.msk.f32.mxu0 %vm1583_vm0, %v1584_v1  ;;  %54 = vst [vmem:[#allocation2] sm:$0xff] %v1584_v1  ;;  %v60_v3 = vld [vmem:[#allocation6 + $0x8] sm:$0xff]  ;;  %v61_v4 = vld [vmem:[#allocation6 + $0x10] sm:$0xff]  ;;  %v62_v6 = vld [vmem:[#allocation6 + $0x18] sm:$0xff]  ;;  %vm56_vm1 = vcmask 195584   ;;  %s1585_s2 = smov 120  }
  0x39   :  { %1299 = vmatprep.subr.bf16.mxu1 %v1582_v0  ;;  %1062 = vmatprep.mubr.msk.f32.mxu1 %vm1583_vm0, %v1584_v1  ;;  %v1276_v5 = vpack.c.bf16 %v60_v3, %v59_v2  ;;  %v1279_v7 = vpack.c.bf16 %v62_v6, %v61_v4  ;;  %v63_v8 = vld [vmem:[#allocation6 + $0x20] sm:$0xff]  ;;  %v64_v9 = vld [vmem:[#allocation6 + $0x28] sm:$0xff]  ;;  %v55_v10 = vld [vmem:[#allocation3] sm:$0xff]  ;;  %s1586_s23 = smov [#allocation9]  }
  0x3a   :  { %v154_v11 = vld [vmem:[#allocation6 + $0x80] sm:$0xff]  ;;  %57 = vst.msk [vmem:[#allocation2] sm:$0xff] %vm56_vm1, %v55_v10  ;;  %v155_v12 = vld [vmem:[#allocation6 + $0x88] sm:$0xff]  ;;  %v156_v13 = vld [vmem:[#allocation6 + $0x90] sm:$0xff]  ;;  %v1282_v15 = vpack.c.bf16 %v64_v9, %v63_v8  ;;  %s841_s24 = sshll.u32 %s1586_s23, 4  ;;  %s842_s24 = int_to_ptr.vmem [resolvable:$true] %s841_s24 }
  0x3b   :  { %1277 = vmatpush3.bf16.msra.mxu0 %v1276_v5  ;;  %v157_v14 = vld [vmem:[#allocation6 + $0x98] sm:$0xff]  ;;  %v1300_v16 = vpack.c.bf16 %v155_v12, %v154_v11  ;;  %v65_v17 = vld [vmem:[#allocation6 + $0x30] sm:$0xff]  ;;  %v158_v20 = vld [vmem:[#allocation6 + $0xa0] sm:$0xff]  ;;  %s1547_s25 = scalar_lea.vmem %s842_s24, 128  ;;  %p1552_p11 = scmp.lt.s32.totalorder %s842_s24, %s842_s24 }
  0x3c   :  { %1278 = vmatprep.subr.bf16.mxu0 %v1582_v0  ;;  %v66_v18 = vld [vmem:[#allocation6 + $0x38] sm:$0xff]  ;;  %v1303_v19 = vpack.c.bf16 %v157_v14, %v156_v13  ;;  %v159_v21 = vld [vmem:[#allocation6 + $0xa8] sm:$0xff]  ;;  %v67_v23 = vld [vmem:[#allocation6 + $0x40] sm:$0xff]  ;;  %p1548_p10 = scmp.ne.s32.totalorder %s842_s24, %s1547_s25  ;;  %p1553_p12 = scmp.lt.s32.totalorder %s1547_s25, %s1547_s25 }
  0x3d   :  { %1301 = vmatpush3.bf16.msra.mxu1 %v1300_v16  ;;  %v1285_v22 = vpack.c.bf16 %v66_v18, %v65_v17  ;;  %v68_v24 = vld [vmem:[#allocation6 + $0x48] sm:$0xff]  ;;  %v1306_v25 = vpack.c.bf16 %v159_v21, %v158_v20  ;;  %v160_v26 = vld [vmem:[#allocation6 + $0xb0] sm:$0xff]  ;;  %v161_v27 = vld [vmem:[#allocation6 + $0xb8] sm:$0xff] }
  0x3e   :  { %1302 = vmatprep.subr.bf16.mxu1 %v1582_v0  ;;  %v1288_v28 = vpack.c.bf16 %v68_v24, %v67_v23  ;;  %v69_v29 = vld [vmem:[#allocation6 + $0x50] sm:$0xff]  ;;  %v70_v30 = vld [vmem:[#allocation6 + $0x58] sm:$0xff]  ;;  %v1309_v31 = vpack.c.bf16 %v161_v27, %v160_v26  ;;  %v162_v32 = vld [vmem:[#allocation6 + $0xc0] sm:$0xff]  ;;  %p1554_p13 = por %p1553_p12, %p1552_p11 }
  0x3f   :  { %1280 = vmatpush3.bf16.msra.mxu0 %v1279_v7  ;;  %v163_v33 = vld [vmem:[#allocation6 + $0xc8] sm:$0xff]  ;;  %v1291_v34 = vpack.c.bf16 %v70_v30, %v69_v29  ;;  %v71_v35 = vld [vmem:[#allocation6 + $0x60] sm:$0xff]  ;;  %v164_v38 = vld [vmem:[#allocation6 + $0xd0] sm:$0xff] }
  0x40   :  { %1281 = vmatprep.subr.bf16.mxu0 %v1582_v0  ;;  %v72_v36 = vld [vmem:[#allocation6 + $0x68] sm:$0xff]  ;;  %v1312_v37 = vpack.c.bf16 %v163_v33, %v162_v32  ;;  %v165_v39 = vld [vmem:[#allocation6 + $0xd8] sm:$0xff]  ;;  %v73_v41 = vld [vmem:[#allocation6 + $0x70] sm:$0xff]  ;;  %p1555_p0 = pnand %p1554_p13, %p1548_p10 }
  0x41   :  { %1304 = vmatpush3.bf16.msra.mxu1 %v1303_v19  ;;  %v1294_v40 = vpack.c.bf16 %v72_v36, %v71_v35  ;;  %v74_v42 = vld [vmem:[#allocation6 + $0x78] sm:$0xff]  ;;  %v1315_v43 = vpack.c.bf16 %v165_v39, %v164_v38  ;;  %v166_v44 = vld [vmem:[#allocation6 + $0xe0] sm:$0xff]  ;;  %v167_v45 = vld [vmem:[#allocation6 + $0xe8] sm:$0xff] }
  0x42   :  { %1305 = vmatprep.subr.bf16.mxu1 %v1582_v0  ;;  %v1297_v46 = vpack.c.bf16 %v74_v42, %v73_v41  ;;  %v1318_v47 = vpack.c.bf16 %v167_v45, %v166_v44  ;;  %v1663_v48 = vld [vmem:[#allocation2] sm:$0xff]  ;;  %v169_v50 = vld [vmem:[#allocation6 + $0xf8] sm:$0xff]  ;;  %v250_v52 = vld [vmem:[#allocation6 + $0x100] sm:$0xff] }
  0x43   :  { %1283 = vmatpush3.bf16.msra.mxu0 %v1282_v15  ;;  %v168_v49 = vld [vmem:[#allocation6 + $0xf0] sm:$0xff]  ;;  %v251_v53 = vld [vmem:[#allocation6 + $0x108] sm:$0xff]  ;;  %v253_v56 = vld [vmem:[#allocation6 + $0x118] sm:$0xff] }
  0x44   :  { %1284 = vmatprep.subr.bf16.mxu0 %v1582_v0  ;;  %v1321_v51 = vpack.c.bf16 %v169_v50, %v168_v49  ;;  %v252_v54 = vld [vmem:[#allocation6 + $0x110] sm:$0xff]  ;;  %v1324_v55 = vpack.c.bf16 %v251_v53, %v250_v52  ;;  %v254_v58 = vld [vmem:[#allocation6 + $0x120] sm:$0xff]  ;;  %v255_v59 = vld [vmem:[#allocation6 + $0x128] sm:$0xff] }
  0x45   :  { %1307 = vmatpush3.bf16.msra.mxu1 %v1306_v25  ;;  %v1327_v57 = vpack.c.bf16 %v253_v56, %v252_v54  ;;  %v1330_v60 = vpack.c.bf16 %v255_v59, %v254_v58  ;;  %v256_v61 = vld [vmem:[#allocation6 + $0x130] sm:$0xff]  ;;  %v257_v62 = vld [vmem:[#allocation6 + $0x138] sm:$0xff]  ;;  %v258_v2 = vld [vmem:[#allocation6 + $0x140] sm:$0xff] }
  0x46   :  { %1308 = vmatprep.subr.bf16.mxu1 %v1582_v0  ;;  %v1333_v63 = vpack.c.bf16 %v257_v62, %v256_v61  ;;  %v259_v3 = vld [vmem:[#allocation6 + $0x148] sm:$0xff]  ;;  %v260_v5 = vld [vmem:[#allocation6 + $0x150] sm:$0xff]  ;;  %v261_v6 = vld [vmem:[#allocation6 + $0x158] sm:$0xff] }
  0x47   :  { %1286 = vmatpush3.bf16.msra.mxu0 %v1285_v22  ;;  %v1336_v4 = vpack.c.bf16 %v259_v3, %v258_v2  ;;  %v1339_v7 = vpack.c.bf16 %v261_v6, %v260_v5  ;;  %v262_v8 = vld [vmem:[#allocation6 + $0x160] sm:$0xff]  ;;  %v263_v9 = vld [vmem:[#allocation6 + $0x168] sm:$0xff]  ;;  %v264_v16 = vld [vmem:[#allocation6 + $0x170] sm:$0xff] }
  0x48   :  { %1287 = vmatprep.subr.bf16.mxu0 %v1582_v0  ;;  %v1342_v10 = vpack.c.bf16 %v263_v9, %v262_v8  ;;  %v851_v11 = vld [vmem:[#allocation8] ss:$0 sm:$0xff]  ;;  %v265_v17 = vld [vmem:[#allocation6 + $0x178] sm:$0xff]  ;;  %v347_v20 = vld [vmem:[#allocation6 + $0x188] sm:$0xff] }
  0x49   :  { %1310 = vmatpush3.bf16.msra.mxu1 %v1309_v31  ;;  %v1345_v18 = vpack.c.bf16 %v265_v17, %v264_v16  ;;  %v346_v19 = vld [vmem:[#allocation6 + $0x180] sm:$0xff]  ;;  %v348_v21 = vld [vmem:[#allocation6 + $0x190] sm:$0xff]  ;;  %v349_v23 = vld [vmem:[#allocation6 + $0x198] sm:$0xff] }
  0x4a   :  { %1311 = vmatprep.subr.bf16.mxu1 %v1582_v0  ;;  %v1348_v22 = vpack.c.bf16 %v347_v20, %v346_v19  ;;  %v1351_v24 = vpack.c.bf16 %v349_v23, %v348_v21  ;;  %v350_v25 = vld [vmem:[#allocation6 + $0x1a0] sm:$0xff]  ;;  %v351_v26 = vld [vmem:[#allocation6 + $0x1a8] sm:$0xff]  ;;  %v353_v29 = vld [vmem:[#allocation6 + $0x1b8] sm:$0xff] }
  0x4b   :  { %1289 = vmatpush3.bf16.msra.mxu0 %v1288_v28  ;;  %v1354_v27 = vpack.c.bf16 %v351_v26, %v350_v25  ;;  %v352_v28 = vld [vmem:[#allocation6 + $0x1b0] sm:$0xff]  ;;  %v354_v31 = vld [vmem:[#allocation6 + $0x1c0] sm:$0xff]  ;;  %v355_v32 = vld [vmem:[#allocation6 + $0x1c8] sm:$0xff] }
  0x4c   :  { %1290 = vmatprep.subr.bf16.mxu0 %v1582_v0  ;;  %v1357_v30 = vpack.c.bf16 %v353_v29, %v352_v28  ;;  %v1360_v33 = vpack.c.bf16 %v355_v32, %v354_v31  ;;  %v357_v35 = vld [vmem:[#allocation6 + $0x1d8] sm:$0xff]  ;;  %v359_v38 = vld [vmem:[#allocation6 + $0x1e8] sm:$0xff]  ;;  %v360_v45 = vld [vmem:[#allocation6 + $0x1f0] sm:$0xff] }
  0x4d   :  { %1313 = vmatpush3.bf16.msra.mxu1 %v1312_v37  ;;  %v358_v37 = vld [vmem:[#allocation6 + $0x1e0] sm:$0xff]  ;;  %v452_v56 = vld [vmem:[#allocation6 + $0x210] sm:$0xff]  ;;  %v453_v58 = vld [vmem:[#allocation6 + $0x218] sm:$0xff] }
  0x4e   :  { %1314 = vmatprep.subr.bf16.mxu1 %v1582_v0  ;;  %v1366_v39 = vpack.c.bf16 %v359_v38, %v358_v37  ;;  %v853_v49 = vld [vmem:[#allocation8 + $0x2] ss:$0 sm:$0xff]  ;;  %v1375_v59 = vpack.c.bf16 %v453_v58, %v452_v56  ;;  %v455_v61 = vld [vmem:[#allocation6 + $0x228] sm:$0xff]  ;;  %v457_v2 = vld [vmem:[#allocation6 + $0x238] sm:$0xff] }
  0x4f   :  { %1292 = vmatpush3.bf16.msra.mxu0 %v1291_v34  ;;  %v356_v34 = vld [vmem:[#allocation6 + $0x1d0] sm:$0xff]  ;;  %v450_v54 = vld [vmem:[#allocation6 + $0x200] sm:$0xff]  ;;  %v459_v5 = vld [vmem:[#allocation6 + $0x248] sm:$0xff] }
  0x50   :  { %1293 = vmatprep.subr.bf16.mxu0 %v1582_v0  ;;  %v1363_v36 = vpack.c.bf16 %v357_v35, %v356_v34  ;;  %v461_v8 = vld [vmem:[#allocation6 + $0x258] sm:$0xff]  ;;  %v546_v20 = vld [vmem:[#allocation6 + $0x280] sm:$0xff]  ;;  %v547_v21 = vld [vmem:[#allocation6 + $0x288] sm:$0xff] }
  0x51   :  { %1316 = vmatpush3.bf16.msra.mxu1 %v1315_v43  ;;  %v1396_v23 = vpack.c.bf16 %v547_v21, %v546_v20  ;;  %v550_v26 = vld [vmem:[#allocation6 + $0x2a0] sm:$0xff]  ;;  %v552_v29 = vld [vmem:[#allocation6 + $0x2b0] sm:$0xff] }
  0x52   :  { %1317 = vmatprep.subr.bf16.mxu1 %v1582_v0  ;;  %v554_v32 = vld [vmem:[#allocation6 + $0x2c0] sm:$0xff]  ;;  %v556_v35 = vld [vmem:[#allocation6 + $0x2d0] sm:$0xff] }
  0x53   :  { %1295 = vmatpush3.bf16.msra.mxu0 %v1294_v40  ;;  %v852_v40 = vld [vmem:[#allocation8 + $0x1] ss:$0 sm:$0xff]  ;;  %v740_v20 = vld [vmem:[#allocation6 + $0x390] sm:$0xff] }
  0x54   :  { %1296 = vmatprep.subr.bf16.mxu0 %v1582_v0  ;;  %v558_v38 = vld [vmem:[#allocation6 + $0x2e0] sm:$0xff] }
  0x55   :  { %1319 = vmatpush3.bf16.msra.mxu1 %v1318_v47 }
  0x56   :  { %1320 = vmatprep.subr.bf16.mxu1 %v1582_v0 }
  0x57   :  { %1298 = vmatpush3.bf16.msra.mxu0 %v1297_v46  ;;  %v361_v46 = vld [vmem:[#allocation6 + $0x1f8] sm:$0xff] }
  0x58   :  { %1323 = vmatprep.subr.bf16.mxu0 %v1582_v0  ;;  %v1369_v47 = vpack.c.bf16 %v361_v46, %v360_v45 }
  0x59   :  { %1322 = vmatpush3.bf16.msra.mxu1 %v1321_v51 }
  0x5a   :  { %1028 = vmatmul.mubr.f32.vlgmr.msra.gmra.mrb[0].mxu0 %v1663_v48  ;;  %1347 = vmatprep.subr.bf16.mxu1 %v1582_v0 }
  0x5b   :  { %1097 = vmatprep.mubr.msk.f32.mxu0 %vm1583_vm0, %v1584_v1  ;;  %1325 = vmatpush3.bf16.msra.mxu0 %v1324_v55  ;;  %v451_v55 = vld [vmem:[#allocation6 + $0x208] sm:$0xff] }
  0x5c   :  { %1326 = vmatprep.subr.bf16.mxu0 %v1582_v0 }
  0x5f   :  { %1328 = vmatpush3.bf16.msra.mxu0 %v1327_v57  ;;  %v1372_v57 = vpack.c.bf16 %v451_v55, %v450_v54  ;;  %v645_v55 = vld [vmem:[#allocation6 + $0x318] sm:$0xff] }
  0x60   :  { %1329 = vmatprep.subr.bf16.mxu0 %v1582_v0 }
  0x63   :  { %1331 = vmatpush3.bf16.msra.mxu0 %v1330_v60  ;;  %v454_v60 = vld [vmem:[#allocation6 + $0x220] sm:$0xff] }
  0x64   :  { %1332 = vmatprep.subr.bf16.mxu0 %v1582_v0  ;;  %v1378_v62 = vpack.c.bf16 %v455_v61, %v454_v60  ;;  %v649_v60 = vld [vmem:[#allocation6 + $0x338] sm:$0xff] }
  0x67   :  { %1334 = vmatpush3.bf16.msra.mxu0 %v1333_v63  ;;  %v456_v63 = vld [vmem:[#allocation6 + $0x230] sm:$0xff] }
  0x68   :  { %1335 = vmatprep.subr.bf16.mxu0 %v1582_v0  ;;  %v1381_v3 = vpack.c.bf16 %v457_v2, %v456_v63  ;;  %v651_v63 = vld [vmem:[#allocation6 + $0x348] sm:$0xff] }
  0x6b   :  { %1337 = vmatpush3.bf16.msra.mxu0 %v1336_v4  ;;  %v458_v4 = vld [vmem:[#allocation6 + $0x240] sm:$0xff] }
  0x6c   :  { %1338 = vmatprep.subr.bf16.mxu0 %v1582_v0  ;;  %v1384_v6 = vpack.c.bf16 %v459_v5, %v458_v4  ;;  %v653_v4 = vld [vmem:[#allocation6 + $0x358] sm:$0xff] }
  0x6f   :  { %1340 = vmatpush3.bf16.msra.mxu0 %v1339_v7  ;;  %v460_v7 = vld [vmem:[#allocation6 + $0x250] sm:$0xff] }
  0x70   :  { %1341 = vmatprep.subr.bf16.mxu0 %v1582_v0  ;;  %v1387_v9 = vpack.c.bf16 %v461_v8, %v460_v7  ;;  %v655_v7 = vld [vmem:[#allocation6 + $0x368] sm:$0xff] }
  0x73   :  { %1343 = vmatpush3.bf16.msra.mxu0 %v1342_v10  ;;  %v462_v10 = vld [vmem:[#allocation6 + $0x260] sm:$0xff] }
  0x74   :  { %1344 = vmatprep.subr.bf16.mxu0 %v1582_v0 }
  0x77   :  { %1346 = vmatpush3.bf16.msra.mxu0 %v1345_v18 }
  0x78   :  { %1371 = vmatprep.subr.bf16.mxu0 %v1582_v0 }
 0x12d   :  { %v148_v12 = vpop.f32.mrb[0].mxu0 }
 0x12e   :  { %v149_v13 = vadd.f32 %v851_v11, %v148_v12  ;;  %v1029_v14 = vpop.f32.mrb[1].mxu0  ;;  %v463_v11 = vld [vmem:[#allocation6 + $0x268] sm:$0xff]  ;;  %v854_v12 = vld [vmem:[#allocation8 + $0x3] ss:$0 sm:$0xff] }
 0x12f   :  { %v464_v14 = vld [vmem:[#allocation6 + $0x270] sm:$0xff] }
 0x130   :  { %v152_v15 = vmax.f32 %v149_v13, 0.0  ;;  %v1390_v13 = vpack.c.bf16 %v463_v11, %v462_v10 }
 0x132   :  { %1063 = vmatmul.mubr.f32.vlgmr.msra.gmra.mrb[0].mxu1 %v152_v15  ;;  %v465_v15 = vld [vmem:[#allocation6 + $0x278] sm:$0xff] }
 0x133   :  { %1132 = vmatprep.mubr.msk.f32.mxu1 %vm1583_vm0, %v1584_v1  ;;  %1349 = vmatpush3.bf16.msra.mxu1 %v1348_v22  ;;  %v1393_v19 = vpack.c.bf16 %v465_v15, %v464_v14  ;;  %v548_v22 = vld [vmem:[#allocation6 + $0x290] sm:$0xff]  ;;  %v657_v15 = vld [vmem:[#allocation6 + $0x378] sm:$0xff] }
 0x134   :  { %1350 = vmatprep.subr.bf16.mxu1 %v1582_v0  ;;  %v656_v14 = vld [vmem:[#allocation6 + $0x370] sm:$0xff] }
 0x137   :  { %1352 = vmatpush3.bf16.msra.mxu1 %v1351_v24  ;;  %v549_v24 = vld [vmem:[#allocation6 + $0x298] sm:$0xff] }
 0x138   :  { %1353 = vmatprep.subr.bf16.mxu1 %v1582_v0  ;;  %v1399_v25 = vpack.c.bf16 %v549_v24, %v548_v22  ;;  %v741_v22 = vld [vmem:[#allocation6 + $0x398] sm:$0xff]  ;;  %v742_v24 = vld [vmem:[#allocation6 + $0x3a0] sm:$0xff] }
 0x13b   :  { %1355 = vmatpush3.bf16.msra.mxu1 %v1354_v27  ;;  %v551_v27 = vld [vmem:[#allocation6 + $0x2a8] sm:$0xff] }
 0x13c   :  { %1356 = vmatprep.subr.bf16.mxu1 %v1582_v0  ;;  %v1402_v28 = vpack.c.bf16 %v551_v27, %v550_v26  ;;  %v745_v27 = vld [vmem:[#allocation6 + $0x3b8] sm:$0xff] }
 0x13f   :  { %1358 = vmatpush3.bf16.msra.mxu1 %v1357_v30  ;;  %v553_v30 = vld [vmem:[#allocation6 + $0x2b8] sm:$0xff] }
 0x140   :  { %1359 = vmatprep.subr.bf16.mxu1 %v1582_v0  ;;  %v1405_v31 = vpack.c.bf16 %v553_v30, %v552_v29  ;;  %v746_v29 = vld [vmem:[#allocation6 + $0x3c0] sm:$0xff]  ;;  %v747_v30 = vld [vmem:[#allocation6 + $0x3c8] sm:$0xff] }
 0x143   :  { %1361 = vmatpush3.bf16.msra.mxu1 %v1360_v33  ;;  %v555_v33 = vld [vmem:[#allocation6 + $0x2c8] sm:$0xff] }
 0x144   :  { %1362 = vmatprep.subr.bf16.mxu1 %v1582_v0  ;;  %v1408_v34 = vpack.c.bf16 %v555_v33, %v554_v32  ;;  %v748_v32 = vld [vmem:[#allocation6 + $0x3d0] sm:$0xff]  ;;  %v749_v33 = vld [vmem:[#allocation6 + $0x3d8] sm:$0xff] }
 0x147   :  { %1364 = vmatpush3.bf16.msra.mxu1 %v1363_v36  ;;  %v557_v36 = vld [vmem:[#allocation6 + $0x2d8] sm:$0xff] }
 0x148   :  { %1365 = vmatprep.subr.bf16.mxu1 %v1582_v0  ;;  %v1411_v37 = vpack.c.bf16 %v557_v36, %v556_v35  ;;  %v750_v35 = vld [vmem:[#allocation6 + $0x3e0] sm:$0xff]  ;;  %v751_v36 = vld [vmem:[#allocation6 + $0x3e8] sm:$0xff] }
 0x14b   :  { %1367 = vmatpush3.bf16.msra.mxu1 %v1366_v39  ;;  %v559_v39 = vld [vmem:[#allocation6 + $0x2e8] sm:$0xff] }
 0x14c   :  { %1368 = vmatprep.subr.bf16.mxu1 %v1582_v0 }
 0x14f   :  { %1370 = vmatpush3.bf16.msra.mxu1 %v1369_v47  ;;  %v560_v47 = vld [vmem:[#allocation6 + $0x2f0] sm:$0xff] }
 0x150   :  { %1395 = vmatprep.subr.bf16.mxu1 %v1582_v0 }
 0x205   :  { %v244_v41 = vpop.f32.mrb[0].mxu1 }
 0x206   :  { %v245_v42 = vadd.f32 %v852_v40, %v244_v41  ;;  %v1064_v43 = vpop.f32.mrb[1].mxu1  ;;  %v1414_v40 = vpack.c.bf16 %v559_v39, %v558_v38  ;;  %v856_v38 = vld [vmem:[#allocation8 + $0x5] ss:$0 sm:$0xff] }
 0x208   :  { %v248_v44 = vmax.f32 %v245_v42, 0.0 }
 0x20a   :  { %1098 = vmatmul.mubr.f32.vlgmr.msra.gmra.mrb[2].mxu0 %v248_v44 }
 0x20b   :  { %1167 = vmatprep.mubr.msk.f32.mxu0 %vm1583_vm0, %v1584_v1  ;;  %1373 = vmatpush3.bf16.msra.mxu0 %v1372_v57  ;;  %v647_v57 = vld [vmem:[#allocation6 + $0x328] sm:$0xff] }
 0x20c   :  { %1374 = vmatprep.subr.bf16.mxu0 %v1582_v0 }
 0x20f   :  { %1376 = vmatpush3.bf16.msra.mxu0 %v1375_v59  ;;  %v648_v59 = vld [vmem:[#allocation6 + $0x330] sm:$0xff] }
 0x210   :  { %1377 = vmatprep.subr.bf16.mxu0 %v1582_v0  ;;  %v1429_v61 = vpack.c.bf16 %v649_v60, %v648_v59 }
 0x213   :  { %1379 = vmatpush3.bf16.msra.mxu0 %v1378_v62  ;;  %v650_v62 = vld [vmem:[#allocation6 + $0x340] sm:$0xff] }
 0x214   :  { %1380 = vmatprep.subr.bf16.mxu0 %v1582_v0  ;;  %v1432_v2 = vpack.c.bf16 %v651_v63, %v650_v62 }
 0x217   :  { %1382 = vmatpush3.bf16.msra.mxu0 %v1381_v3  ;;  %v652_v3 = vld [vmem:[#allocation6 + $0x350] sm:$0xff] }
 0x218   :  { %1383 = vmatprep.subr.bf16.mxu0 %v1582_v0  ;;  %v1435_v5 = vpack.c.bf16 %v653_v4, %v652_v3 }
 0x21b   :  { %1385 = vmatpush3.bf16.msra.mxu0 %v1384_v6  ;;  %v654_v6 = vld [vmem:[#allocation6 + $0x360] sm:$0xff] }
 0x21c   :  { %1386 = vmatprep.subr.bf16.mxu0 %v1582_v0  ;;  %v1438_v8 = vpack.c.bf16 %v655_v7, %v654_v6 }
 0x21f   :  { %1388 = vmatpush3.bf16.msra.mxu0 %v1387_v9  ;;  %v855_v9 = vld [vmem:[#allocation8 + $0x4] ss:$0 sm:$0xff] }
 0x220   :  { %1389 = vmatprep.subr.bf16.mxu0 %v1582_v0 }
 0x223   :  { %1391 = vmatpush3.bf16.msra.mxu0 %v1390_v13 }
 0x224   :  { %1392 = vmatprep.subr.bf16.mxu0 %v1582_v0 }
 0x227   :  { %1394 = vmatpush3.bf16.msra.mxu0 %v1393_v19  ;;  %v739_v19 = vld [vmem:[#allocation6 + $0x388] sm:$0xff] }
 0x228   :  { %1419 = vmatprep.subr.bf16.mxu0 %v1582_v0 }
 0x2dd   :  { %v340_v50 = vpop.f32.mrb[2].mxu0 }
 0x2de   :  { %v341_v51 = vadd.f32 %v853_v49, %v340_v50  ;;  %v1099_v52 = vpop.f32.mrb[3].mxu0  ;;  %v561_v49 = vld [vmem:[#allocation6 + $0x2f8] sm:$0xff] }
 0x2df   :  { %v1417_v50 = vpack.c.bf16 %v561_v49, %v560_v47  ;;  %v643_v52 = vld [vmem:[#allocation6 + $0x308] sm:$0xff] }
 0x2e0   :  { %v344_v53 = vmax.f32 %v341_v51, 0.0  ;;  %v642_v51 = vld [vmem:[#allocation6 + $0x300] sm:$0xff] }
 0x2e1   :  { %v1420_v54 = vpack.c.bf16 %v643_v52, %v642_v51  ;;  %v858_v52 = vld [vmem:[#allocation8 + $0x7] ss:$0 sm:$0xff] }
 0x2e2   :  { %1133 = vmatmul.mubr.f32.vlgmr.msra.gmra.mrb[2].mxu1 %v344_v53  ;;  %v644_v53 = vld [vmem:[#allocation6 + $0x310] sm:$0xff] }
 0x2e3   :  { %1202 = vmatprep.mubr.msk.f32.mxu1 %vm1583_vm0, %v1584_v1  ;;  %1397 = vmatpush3.bf16.msra.mxu1 %v1396_v23  ;;  %v1423_v56 = vpack.c.bf16 %v645_v55, %v644_v53  ;;  %v1447_v23 = vpack.c.bf16 %v741_v22, %v740_v20 }
 0x2e4   :  { %1398 = vmatprep.subr.bf16.mxu1 %v1582_v0 }
 0x2e7   :  { %1400 = vmatpush3.bf16.msra.mxu1 %v1399_v25  ;;  %v743_v25 = vld [vmem:[#allocation6 + $0x3a8] sm:$0xff] }
 0x2e8   :  { %1401 = vmatprep.subr.bf16.mxu1 %v1582_v0  ;;  %v1450_v26 = vpack.c.bf16 %v743_v25, %v742_v24 }
 0x2eb   :  { %1403 = vmatpush3.bf16.msra.mxu1 %v1402_v28 }
 0x2ec   :  { %1404 = vmatprep.subr.bf16.mxu1 %v1582_v0 }
 0x2ef   :  { %1406 = vmatpush3.bf16.msra.mxu1 %v1405_v31  ;;  %v1456_v31 = vpack.c.bf16 %v747_v30, %v746_v29 }
 0x2f0   :  { %1407 = vmatprep.subr.bf16.mxu1 %v1582_v0 }
 0x2f3   :  { %1409 = vmatpush3.bf16.msra.mxu1 %v1408_v34  ;;  %v1459_v34 = vpack.c.bf16 %v749_v33, %v748_v32 }
 0x2f4   :  { %1410 = vmatprep.subr.bf16.mxu1 %v1582_v0 }
 0x2f7   :  { %1412 = vmatpush3.bf16.msra.mxu1 %v1411_v37  ;;  %v1462_v37 = vpack.c.bf16 %v751_v36, %v750_v35 }
 0x2f8   :  { %1413 = vmatprep.subr.bf16.mxu1 %v1582_v0 }
 0x2fb   :  { %1415 = vmatpush3.bf16.msra.mxu1 %v1414_v40 }
 0x2fc   :  { %1416 = vmatprep.subr.bf16.mxu1 %v1582_v0 }
 0x2ff   :  { %1418 = vmatpush3.bf16.msra.mxu1 %v1417_v50 }
 0x300   :  { %1443 = vmatprep.subr.bf16.mxu1 %v1582_v0 }
 0x3b5   :  { %v436_v16 = vpop.f32.mrb[2].mxu1 }
 0x3b6   :  { %v1699_v17 = vadd.f32 %v854_v12, %v436_v16  ;;  %v1134_v18 = vpop.f32.mrb[3].mxu1  ;;  %v1441_v16 = vpack.c.bf16 %v657_v15, %v656_v14 }
 0x3b7   :  { %v738_v18 = vld [vmem:[#allocation6 + $0x380] sm:$0xff] }
 0x3b8   :  { %441 = vrot.lane.b32.xlu0 %v1699_v17, %s1585_s2  ;;  %v1444_v21 = vpack.c.bf16 %v739_v19, %v738_v18 }
 0x42a   :  { %v442_v41 = vpop.permute.xlu0 %441 }
 0x42b   :  { %v443_v42 = vmul.f32 0.5, %v442_v41 }
 0x42d   :  { %v444_v43 = vmul.f32 1.442695, %v443_v42 }
 0x42f   :  { %1479 = vpow2.f32 %v444_v43  ;;  %v752_v43 = vld [vmem:[#allocation6 + $0x3f0] sm:$0xff] }
 0x439   :  { %v1480_v44 = vpop.eup %1479 }
 0x43a   :  { %v447_v45 = vmul.f32 %v1480_v44, %v1663_v48  ;;  %v646_v48 = vld [vmem:[#allocation6 + $0x320] sm:$0xff]  ;;  %v753_v44 = vld [vmem:[#allocation6 + $0x3f8] sm:$0xff] }
 0x43b   :  { %v1426_v58 = vpack.c.bf16 %v647_v57, %v646_v48 }
 0x43c   :  { %v448_v46 = vadd.f32 %v447_v45, %v1699_v17  ;;  %v1465_v45 = vpack.c.bf16 %v753_v44, %v752_v43 }
 0x43e   :  { %1168 = vmatmul.mubr.f32.vlgmr.msra.gmra.mrb[4].mxu0 %v448_v46  ;;  %v857_v46 = vld [vmem:[#allocation8 + $0x6] ss:$0 sm:$0xff] }
 0x43f   :  { %1237 = vmatprep.mubr.msk.f32.mxu0 %vm1583_vm0, %v1584_v1  ;;  %1421 = vmatpush3.bf16.msra.mxu0 %v1420_v54 }
 0x440   :  { %1422 = vmatprep.subr.bf16.mxu0 %v1582_v0 }
 0x443   :  { %1424 = vmatpush3.bf16.msra.mxu0 %v1423_v56 }
 0x444   :  { %1425 = vmatprep.subr.bf16.mxu0 %v1582_v0 }
 0x447   :  { %1427 = vmatpush3.bf16.msra.mxu0 %v1426_v58 }
 0x448   :  { %1428 = vmatprep.subr.bf16.mxu0 %v1582_v0 }
 0x44b   :  { %1430 = vmatpush3.bf16.msra.mxu0 %v1429_v61 }
 0x44c   :  { %1431 = vmatprep.subr.bf16.mxu0 %v1582_v0 }
 0x44f   :  { %1433 = vmatpush3.bf16.msra.mxu0 %v1432_v2 }
 0x450   :  { %1434 = vmatprep.subr.bf16.mxu0 %v1582_v0 }
 0x453   :  { %1436 = vmatpush3.bf16.msra.mxu0 %v1435_v5 }
 0x454   :  { %1437 = vmatprep.subr.bf16.mxu0 %v1582_v0 }
 0x457   :  { %1439 = vmatpush3.bf16.msra.mxu0 %v1438_v8 }
 0x458   :  { %1440 = vmatprep.subr.bf16.mxu0 %v1582_v0 }
 0x45b   :  { %1442 = vmatpush3.bf16.msra.mxu0 %v1441_v16 }
 0x511   :  { %v540_v10 = vpop.f32.mrb[4].mxu0 }
 0x512   :  { %v541_v11 = vadd.f32 %v855_v9, %v540_v10  ;;  %v1169_v12 = vpop.f32.mrb[5].mxu0 }
 0x514   :  { %v544_v13 = vmax.f32 %v541_v11, 0.0 }
 0x516   :  { %1203 = vmatmul.mubr.f32.vlgmr.msra.gmra.mrb[4].mxu1 %v544_v13 }
 0x517   :  { %1272 = vmatprep.mubr.msk.f32.mxu1 %vm1583_vm0, %v1584_v1  ;;  %1445 = vmatpush3.bf16.msra.mxu1 %v1444_v21  ;;  %v744_v1 = vld [vmem:[#allocation6 + $0x3b0] sm:$0xff] }
 0x518   :  { %1446 = vmatprep.subr.bf16.mxu1 %v1582_v0  ;;  %v1453_v28 = vpack.c.bf16 %v745_v27, %v744_v1 }
 0x51b   :  { %1448 = vmatpush3.bf16.msra.mxu1 %v1447_v23 }
 0x51c   :  { %1449 = vmatprep.subr.bf16.mxu1 %v1582_v0 }
 0x51f   :  { %1451 = vmatpush3.bf16.msra.mxu1 %v1450_v26 }
 0x520   :  { %1452 = vmatprep.subr.bf16.mxu1 %v1582_v0 }
 0x523   :  { %1454 = vmatpush3.bf16.msra.mxu1 %v1453_v28 }
 0x524   :  { %1455 = vmatprep.subr.bf16.mxu1 %v1582_v0 }
 0x527   :  { %1457 = vmatpush3.bf16.msra.mxu1 %v1456_v31 }
 0x528   :  { %1458 = vmatprep.subr.bf16.mxu1 %v1582_v0 }
 0x52b   :  { %1460 = vmatpush3.bf16.msra.mxu1 %v1459_v34 }
 0x52c   :  { %1461 = vmatprep.subr.bf16.mxu1 %v1582_v0 }
 0x52f   :  { %1463 = vmatpush3.bf16.msra.mxu1 %v1462_v37 }
 0x530   :  { %1464 = vmatprep.subr.bf16.mxu1 %v1582_v0 }
 0x533   :  { %1466 = vmatpush3.bf16.msra.mxu1 %v1465_v45 }
 0x5e9   :  { %v636_v39 = vpop.f32.mrb[4].mxu1 }
 0x5ea   :  { %v637_v40 = vadd.f32 %v856_v38, %v636_v39  ;;  %v1204_v41 = vpop.f32.mrb[5].mxu1 }
 0x5ec   :  { %v640_v42 = vmax.f32 %v637_v40, 0.0 }
 0x5ee   :  { %1238 = vmatmul.mubr.f32.vlgmr.msra.gmra.mrb[6].mxu0 %v640_v42 }
 0x6c1   :  { %v732_v47 = vpop.f32.mrb[6].mxu0 }
 0x6c2   :  { %v733_v49 = vadd.f32 %v857_v46, %v732_v47  ;;  %v1239_v50 = vpop.f32.mrb[7].mxu0 }
 0x6c4   :  { %v736_v51 = vmax.f32 %v733_v49, 0.0 }
 0x6c6   :  { %1273 = vmatmul.mubr.f32.vlgmr.msra.gmra.mrb[6].mxu1 %v736_v51 }
 0x799   :  { %v828_v53 = vpop.f32.mrb[6].mxu1 }
 0x79a   :  { %v829_v0 = vadd.f32 %v858_v52, %v828_v53  ;;  %v1274_v54 = vpop.f32.mrb[7].mxu1 }
 0x79c   :  { %v833_v55 = vadd.f32 %v829_v0, %v1699_v17 }
 0x79e   :  { %834 = vst [vmem:[#allocation9] sm:$0xff] %v833_v55 }
 0x79f   :  { %1558 = shalt.err (!%p1555_p0)
}
 0x7a0   :  { %s1559_s28 = scalar_lea.hbm %s1748_s3, 128 }
 0x7a1   :  { %p1560_p1 = scmp.ne.s32.totalorder %s1748_s3, %s1559_s28  ;;  %p1563_p2 = scmp.lt.u32.totalorder %s1559_s28, %s1748_s3 }
 0x7a3   :  { %p1565_p3 = pnand %p1563_p2, %p1560_p1 }
 0x7a5   :  { %1568 = shalt.err (!%p1565_p3)
}
 0x7a6   :  { %844 = dma.vmem_to_hbm [thread:$0]  %s842_s24, 128, %s1748_s3, [#allocation5]  }
 0x7a7   :  { %1573 = dma.done.wait [#allocation5], 128  }
 0x7a8   :  { %1574 = vsyncadd [#allocation5], 4294967168 }
 0x7a9   :  { %848 = vsyncpa [#allocation4], 1 }
 0x7aa   :  { %849 = vsyncpa [#allocation7], 1 }
 0x7ab   :  { %850 = vsyncpa [#allocation5], 1 }

</bundles_post_ra>
